<compile_context>
chip_gen: v7x
topology: tpu7x:2x2x1
jax: 0.10.0
libtpu: 0.0.40
codegen_flags: <defaults>
</compile_context>

<pallas_src>
import math

import numpy as np
import jax
import jax.numpy as jnp
from jax.experimental import pallas as pl
from jax.experimental.pallas import tpu as pltpu


# ----------------------------------------------------------------------------------
# Host-side graph / parameter construction (mirrors find_neighbor, SkeletonLinear,
# SkeletonPool.__init__ from the original PyTorch code).
# ----------------------------------------------------------------------------------
def calc_edge_mat(edges):
    n = len(edges)
    mat = [[100000] * n for _ in range(n)]
    for i in range(n):
        mat[i][i] = 0
    for i, a in enumerate(edges):
        for j, b in enumerate(edges):
            link = 0
            for x in range(2):
                for y in range(2):
                    if a[x] == b[y]:
                        link = 1
            if link:
                mat[i][j] = 1
    for k in range(n):
        for i in range(n):
            for j in range(n):
                mat[i][j] = min(mat[i][j], mat[i][k] + mat[k][j])
    return mat


def find_neighbor(edges, d):
    mat = calc_edge_mat(edges)
    neighbor_list = []
    for i in range(len(edges)):
        neighbor_list.append([j for j in range(len(edges)) if mat[i][j] <= d])
    global_part_neighbor = neighbor_list[0].copy()
    for i in global_part_neighbor:
        neighbor_list[i].append(len(edges))
    global_part_neighbor.append(len(edges))
    neighbor_list.append(global_part_neighbor)
    return neighbor_list


def build_skeleton_linear(neighbor_list, in_channels, out_channels, rng):
    """Returns weight (out,in), mask (out,in), bias (out,) — deterministic init."""
    J = len(neighbor_list)
    in_per = in_channels // J
    out_per = out_channels // J
    weight = np.zeros((out_channels, in_channels), np.float32)
    mask = np.zeros((out_channels, in_channels), np.float32)
    for i, nb in enumerate(neighbor_list):
        expanded = [k * in_per + c for k in nb for c in range(in_per)]
        rows = slice(i * out_per, (i + 1) * out_per)
        mask[rows, expanded] = 1.0
        # kaiming_uniform_(a=sqrt(5)) on the dense sub-block -> bound = 1/sqrt(fan_in)
        bound = 1.0 / math.sqrt(len(expanded))
        weight[rows, expanded] = rng.uniform(
            -bound, bound, size=(out_per, len(expanded))
        ).astype(np.float32)
    b_bound = 1.0 / math.sqrt(in_channels)
    bias = rng.uniform(-b_bound, b_bound, size=(out_channels,)).astype(np.float32)
    return weight, mask, bias


def build_skeleton_pool(edges, channels_per_edge):
    """Returns pooling matrix (C_out, C_in) and new_edges (mean pooling)."""
    edge_num = len(edges) + 1
    seq_list, pooling_list, new_edges = [], [], []
    degree = [0] * 100
    for e in edges:
        degree[e[0]] += 1
        degree[e[1]] += 1

    def find_seq(j, seq):
        if degree[j] > 2 and j != 0:
            seq_list.append(seq)
            seq = []
        if degree[j] == 1:
            seq_list.append(seq)
            return
        for idx, e in enumerate(edges):
            if e[0] == j:
                find_seq(e[1], seq + [idx])

    find_seq(0, [])
    for seq in seq_list:
        if len(seq) % 2 == 1:
            pooling_list.append([seq[0]])
            new_edges.append(edges[seq[0]])
            seq = seq[1:]
        for i in range(0, len(seq), 2):
            pooling_list.append([seq[i], seq[i + 1]])
            new_edges.append([edges[seq[i]][0], edges[seq[i + 1]][1]])
    pooling_list.append([edge_num - 1])  # global position channel

    weight = np.zeros(
        (len(pooling_list) * channels_per_edge, edge_num * channels_per_edge),
        np.float32,
    )
    for i, pair in enumerate(pooling_list):
        for j in pair:
            for c in range(channels_per_edge):
                weight[i * channels_per_edge + c, j * channels_per_edge + c] = 1.0 / len(pair)
    return weight, new_edges


def build_static_encoder_raw_params(edges, num_layers, skeleton_dist, seed=0):
    """Per layer: (W (C_mid,C_in), mask, bias (C_mid,), P (C_out,C_mid)); P = I last layer."""
    rng = np.random.default_rng(seed)
    params = []
    channels = 3
    cur_edges = [list(e) for e in edges]
    for i in range(num_layers):
        neighbor_list = find_neighbor(cur_edges, skeleton_dist)
        J = len(neighbor_list)
        in_ch = channels * J
        out_ch = channels * 2 * J
        W, M, b = build_skeleton_linear(neighbor_list, in_ch, out_ch, rng)
        if i < num_layers - 1:
            P, new_edges = build_skeleton_pool(cur_edges, channels * 2)
            cur_edges = new_edges
        else:
            P = np.eye(out_ch, dtype=np.float32)
        params.append((W, M, b, P))
        channels *= 2
    return params


def _round_up(x, m):
    return ((x + m - 1) // m) * m


def prepare_kernel_params(raw_params):
    """Fold (W*mask) and pooling into one matrix per layer, transpose for x @ Wf,
    and zero-pad channel dims to multiples of 128 (lanes)."""
    fused, out_channels = [], []
    for W, M, b, P in raw_params:
        Wf = P @ (W * M)                      # (C_out, C_in)
        bf = P @ b                            # (C_out,)
        c_out, c_in = Wf.shape
        cin_pad = _round_up(c_in, 128)
        cout_pad = _round_up(c_out, 128)
        Wt = np.zeros((cin_pad, cout_pad), np.float32)
        Wt[:c_in, :c_out] = Wf.T              # pre-transposed: y = x @ Wt
        bp = np.zeros((1, cout_pad), np.float32)
        bp[0, :c_out] = bf
        fused.append((jnp.asarray(Wt), jnp.asarray(bp)))
        out_channels.append(c_out)
    return fused, out_channels


# ----------------------------------------------------------------------------------
# Fused Pallas kernel: all encoder layers in one invocation.
#   per layer:  h = LeakyReLU_{0.2}(h @ Wf + bf)   (fold of linear+pool+activation)
# Intermediates stay on-chip; each layer's activation is written to its own output.
# ----------------------------------------------------------------------------------
def _make_fused_kernel(num_layers):
    def kernel(*refs):
        # refs = (x_ref, w0, b0, w1, b1, ..., out0, out1, ...)
        h = refs[0][...]
        for i in range(num_layers):           # static unroll over layers
            w = refs[1 + 2 * i][...]
            b = refs[2 + 2 * i][...]
            y = jnp.dot(h, w, preferred_element_type=jnp.float32) + b
            h = jnp.where(y >= 0.0, y, 0.2 * y)
            refs[1 + 2 * num_layers + i][...] = h
    return kernel


def static_encoder_forward(x, kernel_params, out_channels):
    """Matches StaticEncoder.forward: returns [input, layer1.squeeze(-1), ...]."""
    B = x.shape[0]
    h0 = x.reshape(B, -1).astype(jnp.float32)
    c_in = h0.shape[1]
    cin_pad = kernel_params[0][0].shape[0]
    num_layers = len(kernel_params)

    # Batch tile: small batches run as a single invocation (no grid); large batches
    # are gridded over the padded batch dim ("parallel" -> v7x dual-TC sharding).
    tb = 256 if B > 256 else _round_up(max(B, 1), 8)
    B_pad = _round_up(max(B, 1), tb)

    x_pad = jnp.zeros((B_pad, cin_pad), jnp.float32).at[:B, :c_in].set(h0)

    kernel = _make_fused_kernel(num_layers)
    flat_args = [x_pad]
    out_shapes = []
    for wf, bf in kernel_params:
        flat_args += [wf, bf]
        out_shapes.append(jax.ShapeDtypeStruct((B_pad, wf.shape[1]), jnp.float32))

    if B_pad == tb:
        # Single invocation; all operands are whole-array VMEM blocks (a few KB).
        outs_pad = pl.pallas_call(
            kernel,
            out_shape=tuple(out_shapes),
        )(*flat_args)
    else:
        grid = (B_pad // tb,)
        in_specs = [pl.BlockSpec((tb, cin_pad), lambda i: (i, 0))]
        for wf, bf in kernel_params:
            in_specs.append(pl.BlockSpec(wf.shape, lambda i: (0, 0)))
            in_specs.append(pl.BlockSpec(bf.shape, lambda i: (0, 0)))
        out_specs = tuple(
            pl.BlockSpec((tb, wf.shape[1]), lambda i: (i, 0)) for wf, _ in kernel_params
        )
        outs_pad = pl.pallas_call(
            kernel,
            grid=grid,
            in_specs=in_specs,
            out_specs=out_specs,
            out_shape=tuple(out_shapes),
            compiler_params=pltpu.CompilerParams(
                dimension_semantics=("parallel",)
            ),
        )(*flat_args)

    if not isinstance(outs_pad, (tuple, list)):
        outs_pad = (outs_pad,)

    outputs = [x]
    for o, c in zip(outs_pad, out_channels):
        outputs.append(o[:B, :c])
    return outputs


# ----------------------------------------------------------------------------------
# Pure-numpy reference using the UNFOLDED math (linear -> pool -> LeakyReLU),
# so the host-side weight folding is validated too.
# ----------------------------------------------------------------------------------
def reference_forward(x, raw_params):
    outs = [np.asarray(x)]
    h = np.asarray(x).reshape(x.shape[0], -1).astype(np.float32)
    for W, M, b, P in raw_params:
        lin = h @ (W * M).T + b
        pooled = lin @ P.T
        h = np.where(pooled >= 0.0, pooled, 0.2 * pooled).astype(np.float32)
        outs.append(h)
    return outs


if __name__ == "__main__":
    # Small synthetic skeleton: root (joint 0) with three 3-edge chains, 9 edges total.
    edges = [[0, 1], [1, 2], [2, 3],
             [0, 4], [4, 5], [5, 6],
             [0, 7], [7, 8], [8, 9]]
    num_layers = 2       # args.num_layers
    skeleton_dist = 2    # args.skeleton_dist

    raw_params = build_static_encoder_raw_params(edges, num_layers, skeleton_dist, seed=0)
    kernel_params, out_channels = prepare_kernel_params(raw_params)

    batch = 2
    joints = len(edges) + 1  # includes the virtual global-position edge
    key = jax.random.PRNGKey(0)
    x = jax.random.normal(key, (batch, joints, 3), dtype=jnp.float32)

    outs = static_encoder_forward(x, kernel_params, out_channels)
    outs = [jax.block_until_ready(o) for o in outs]

    ref = reference_forward(x, raw_params)
    assert len(outs) == len(ref) == num_layers + 1
    for got, want in zip(outs, ref):
        assert got.shape == want.shape, (got.shape, want.shape)
        np.testing.assert_allclose(np.asarray(got), want, rtol=1e-4, atol=1e-4)

    print("KERNEL_OK")
</pallas_src>

<mosaic_0001>
module attributes {stable_mosaic.version = 11 : i64} {
  func.func @kernel(%arg0: memref<8x128xf32, #tpu.memory_space<vmem>>, %arg1: memref<128x128xf32, #tpu.memory_space<vmem>>, %arg2: memref<1x128xf32, #tpu.memory_space<vmem>>, %arg3: memref<128x128xf32, #tpu.memory_space<vmem>>, %arg4: memref<1x128xf32, #tpu.memory_space<vmem>>, %arg5: memref<8x128xf32, #tpu.memory_space<vmem>>, %arg6: memref<8x128xf32, #tpu.memory_space<vmem>>) attributes {dimension_semantics = [], scalar_prefetch = 0 : i64, scratch_operands = 0 : i64, tpu.core_type = #tpu.core_type<tc>} {
    %c0 = arith.constant 0 : index
    %c0_0 = arith.constant 0 : index
    %0 = vector.load %arg0[%c0, %c0_0] : memref<8x128xf32, #tpu.memory_space<vmem>>, vector<8x128xf32>
    %c0_1 = arith.constant 0 : index
    %c0_2 = arith.constant 0 : index
    %1 = vector.load %arg1[%c0_1, %c0_2] : memref<128x128xf32, #tpu.memory_space<vmem>>, vector<128x128xf32>
    %c0_3 = arith.constant 0 : index
    %c0_4 = arith.constant 0 : index
    %2 = vector.load %arg2[%c0_3, %c0_4] : memref<1x128xf32, #tpu.memory_space<vmem>>, vector<1x128xf32>
    %cst = arith.constant dense<0.000000e+00> : vector<8x128xf32>
    %3 = tpu.matmul %0, %1, %cst {dimension_numbers = #tpu.dot_dimension_numbers<[1], [0], [0], [1], [0, 0, 1, 1], [], []>} : vector<8x128xf32>, vector<128x128xf32>, vector<8x128xf32> -> vector<8x128xf32>
    %4 = vector.broadcast %2 : vector<1x128xf32> to vector<8x128xf32>
    %5 = arith.addf %3, %4 : vector<8x128xf32>
    %cst_5 = arith.constant 0.000000e+00 : f32
    %6 = vector.broadcast %cst_5 : f32 to vector<8x128xf32>
    %7 = arith.cmpf oge, %5, %6 : vector<8x128xf32>
    %cst_6 = arith.constant 2.000000e-01 : f32
    %8 = vector.broadcast %cst_6 : f32 to vector<8x128xf32>
    %9 = arith.mulf %8, %5 : vector<8x128xf32>
    %10 = arith.select %7, %5, %9 : vector<8x128xi1>, vector<8x128xf32>
    %c0_7 = arith.constant 0 : index
    %c0_8 = arith.constant 0 : index
    %11 = vector.load %arg5[%c0_7, %c0_8] : memref<8x128xf32, #tpu.memory_space<vmem>>, vector<8x128xf32>
    tpu.vector_store %arg5[%c0_7, %c0_8], %10 {strides = array<i32>} : memref<8x128xf32, #tpu.memory_space<vmem>>, vector<8x128xf32>,
    %c0_9 = arith.constant 0 : index
    %c0_10 = arith.constant 0 : index
    %12 = vector.load %arg3[%c0_9, %c0_10] : memref<128x128xf32, #tpu.memory_space<vmem>>, vector<128x128xf32>
    %c0_11 = arith.constant 0 : index
    %c0_12 = arith.constant 0 : index
    %13 = vector.load %arg4[%c0_11, %c0_12] : memref<1x128xf32, #tpu.memory_space<vmem>>, vector<1x128xf32>
    %cst_13 = arith.constant dense<0.000000e+00> : vector<8x128xf32>
    %14 = tpu.matmul %10, %12, %cst_13 {dimension_numbers = #tpu.dot_dimension_numbers<[1], [0], [0], [1], [0, 0, 1, 1], [], []>} : vector<8x128xf32>, vector<128x128xf32>, vector<8x128xf32> -> vector<8x128xf32>
    %15 = vector.broadcast %13 : vector<1x128xf32> to vector<8x128xf32>
    %16 = arith.addf %14, %15 : vector<8x128xf32>
    %cst_14 = arith.constant 0.000000e+00 : f32
    %17 = vector.broadcast %cst_14 : f32 to vector<8x128xf32>
    %18 = arith.cmpf oge, %16, %17 : vector<8x128xf32>
    %cst_15 = arith.constant 2.000000e-01 : f32
    %19 = vector.broadcast %cst_15 : f32 to vector<8x128xf32>
    %20 = arith.mulf %19, %16 : vector<8x128xf32>
    %21 = arith.select %18, %16, %20 : vector<8x128xi1>, vector<8x128xf32>
    %c0_16 = arith.constant 0 : index
    %c0_17 = arith.constant 0 : index
    %22 = vector.load %arg6[%c0_16, %c0_17] : memref<8x128xf32, #tpu.memory_space<vmem>>, vector<8x128xf32>
    tpu.vector_store %arg6[%c0_16, %c0_17], %21 {strides = array<i32>} : memref<8x128xf32, #tpu.memory_space<vmem>>, vector<8x128xf32>,
    return
  }
}

</mosaic_0001>

<bundles_post_ra>
// kernel: tpu_custom_call.1
= control target key start
LH: loop header
LB: loop body
LE: loop exit
PB: predicated region body
PF: predicated region fallthrough
CT: control target
= control target key end

     0   :  { %12 = vsyncpa [#allocation3], 0  ;;  %s703_s0 = inlined_call_operand.hbm [shape: f32[8,128], index: 0, kind: input, shape index: {}]   ;;  %s704_s1 = inlined_call_operand.hbm [shape: f32[128,128], index: 1, kind: input, shape index: {}]   ;;  %s705_s2 = inlined_call_operand.vmem [shape: f32[1,128], index: 2, kind: input, shape index: {}]   ;;  %s706_s3 = inlined_call_operand.hbm [shape: f32[128,128], index: 3, kind: input, shape index: {}]   ;;  %s707_s4 = inlined_call_operand.vmem [shape: f32[1,128], index: 4, kind: input, shape index: {}]   ;;  %s708_s5 = inlined_call_operand.hbm [shape: f32[8,128], index: 5, kind: output, shape index: {0}]   ;;  %s709_s6 = inlined_call_operand.hbm [shape: f32[8,128], index: 6, kind: output, shape index: {1}]  }
   0x1   :  { %13 = vsyncpa [#allocation6], 0 }
   0x2   :  { %14 = vsyncpa [#allocation4], 0 }
   0x3   :  { %15 = vsyncpa [#allocation10], 0  ;;  %s570_s21 = smov [#allocation5]   ;;  %s452_s25 = scalar_lea.hbm %s704_s1, 2048 }
   0x4   :  { %s31_s22 = sshll.u32 %s570_s21, 4  ;;  %p453_p0 = scmp.ne.s32.totalorder %s704_s1, %s452_s25  ;;  %s32_s22 = int_to_ptr.vmem [resolvable:$true] %s31_s22 }
   0x5   :  { %p456_p1 = scmp.lt.u32.totalorder %s452_s25, %s704_s1 }
   0x7   :  { %p458_p2 = pnand %p456_p1, %p453_p0 }
   0x9   :  { %461 = shalt.err (!%p458_p2)
}
   0xa   :  { %s462_s30 = scalar_lea.vmem %s32_s22, 2048  ;;  %p467_p4 = scmp.lt.s32.totalorder %s32_s22, %s32_s22 }
   0xb   :  { %p463_p3 = scmp.ne.s32.totalorder %s32_s22, %s462_s30  ;;  %p468_p5 = scmp.lt.s32.totalorder %s462_s30, %s462_s30 }
   0xd   :  { %p469_p6 = por %p468_p5, %p467_p4 }
   0xf   :  { %p470_p7 = pnand %p469_p6, %p463_p3 }
  0x11   :  { %473 = shalt.err (!%p470_p7)
}
  0x12   :  { %s571_s7 = smov 128   ;;  %s572_s8 = smov 8  }
  0x13   :  { %37 = dma.hbm_to_vmem [thread:$0]  %s704_s1, 2048, %s32_s22, [#allocation6], %s571_s7, %s571_s7, %s572_s8  }
  0x14   :  { %s573_s11 = smov [#allocation2]   ;;  %s574_s13 = smov [#allocation7]  }
  0x15   :  { %s22_s12 = sshll.u32 %s573_s11, 4  ;;  %s45_s14 = sshll.u32 %s574_s13, 4  ;;  %s23_s12 = int_to_ptr.vmem [resolvable:$true] %s22_s12  ;;  %s46_s14 = int_to_ptr.vmem [resolvable:$true] %s45_s14 }
  0x16   :  { %s474_s17 = scalar_lea.hbm %s703_s0, 128 }
  0x17   :  { %p475_p8 = scmp.ne.s32.totalorder %s703_s0, %s474_s17  ;;  %p478_p9 = scmp.lt.u32.totalorder %s474_s17, %s703_s0 }
  0x19   :  { %p480_p10 = pnand %p478_p9, %p475_p8 }
  0x1b   :  { %483 = shalt.err (!%p480_p10)
}
  0x1c   :  { %s484_s1 = scalar_lea.vmem %s23_s12, 128  ;;  %p489_p12 = scmp.lt.s32.totalorder %s23_s12, %s23_s12 }
  0x1d   :  { %p485_p11 = scmp.ne.s32.totalorder %s23_s12, %s484_s1  ;;  %p490_p13 = scmp.lt.s32.totalorder %s484_s1, %s484_s1 }
  0x1f   :  { %p491_p0 = por %p490_p13, %p489_p12 }
  0x21   :  { %p492_p1 = pnand %p491_p0, %p485_p11 }
  0x23   :  { %495 = shalt.err (!%p492_p1)
}
  0x24   :  { %25 = dma.hbm_to_vmem [thread:$0]  %s703_s0, 128, %s23_s12, [#allocation3]  }
  0x25   :  { %s496_s26 = scalar_lea.hbm %s706_s3, 2048 }
  0x26   :  { %p497_p2 = scmp.ne.s32.totalorder %s706_s3, %s496_s26  ;;  %p500_p3 = scmp.lt.u32.totalorder %s496_s26, %s706_s3 }
  0x28   :  { %p502_p4 = pnand %p500_p3, %p497_p2 }
  0x2a   :  { %505 = shalt.err (!%p502_p4)
}
  0x2b   :  { %s506_s9 = scalar_lea.vmem %s46_s14, 2048  ;;  %p511_p6 = scmp.lt.s32.totalorder %s46_s14, %s46_s14 }
  0x2c   :  { %p507_p5 = scmp.ne.s32.totalorder %s46_s14, %s506_s9  ;;  %p512_p7 = scmp.lt.s32.totalorder %s506_s9, %s506_s9 }
  0x2e   :  { %p513_p8 = por %p512_p7, %p511_p6 }
  0x30   :  { %p514_p9 = pnand %p513_p8, %p507_p5 }
  0x32   :  { %517 = shalt.err (!%p514_p9)
}
  0x33   :  { %51 = dma.hbm_to_vmem [thread:$0]  %s706_s3, 2048, %s46_s14, [#allocation6], %s571_s7, %s571_s7, %s572_s8  }
  0x34   :  { %562 = dma.done.wait [#allocation3], 128  }
  0x35   :  { %563 = vsyncadd [#allocation3], 4294967168 }
  0x36   :  { %564 = dma.done.wait [#allocation6], 4096  }
  0x37   :  { %565 = vsyncadd [#allocation6], 4294963200  ;;  %v575_v0 = vmov 0.0|0.0   ;;  %vm576_vm0 = vmmov 0   ;;  %v577_v1 = vmov 0.0   ;;  %v64_v2 = vld [vmem:[#allocation5] sm:$0xff] }
  0x38   :  { %394 = vmatprep.subr.bf16.mxu0 %v575_v0  ;;  %356 = vmatprep.mubr.msk.f32.mxu0 %vm576_vm0, %v577_v1  ;;  %v65_v3 = vld [vmem:[#allocation5 + $0x8] sm:$0xff]  ;;  %v66_v4 = vld [vmem:[#allocation5 + $0x10] sm:$0xff]  ;;  %v67_v6 = vld [vmem:[#allocation5 + $0x18] sm:$0xff]  ;;  %s578_s8 = smov [#allocation8]  }
  0x39   :  { %418 = vmatprep.subr.bf16.mxu1 %v575_v0  ;;  %391 = vmatprep.mubr.msk.f32.mxu1 %vm576_vm0, %v577_v1  ;;  %v395_v5 = vpack.c.bf16 %v65_v3, %v64_v2  ;;  %v398_v7 = vpack.c.bf16 %v67_v6, %v66_v4  ;;  %v68_v8 = vld [vmem:[#allocation5 + $0x20] sm:$0xff]  ;;  %v69_v9 = vld [vmem:[#allocation5 + $0x28] sm:$0xff]  ;;  %v163_v12 = vld [vmem:[#allocation7 + $0x10] sm:$0xff]  ;;  %s264_s11 = sshll.u32 %s578_s8, 4  ;;  %s265_s11 = int_to_ptr.vmem [resolvable:$true] %s264_s11 }
  0x3a   :  { %v161_v10 = vld [vmem:[#allocation7] sm:$0xff]  ;;  %v162_v11 = vld [vmem:[#allocation7 + $0x8] sm:$0xff]  ;;  %v164_v13 = vld [vmem:[#allocation7 + $0x18] sm:$0xff]  ;;  %v401_v14 = vpack.c.bf16 %v69_v9, %v68_v8  ;;  %s518_s12 = scalar_lea.vmem %s265_s11, 128  ;;  %p523_p11 = scmp.lt.s32.totalorder %s265_s11, %s265_s11 }
  0x3b   :  { %396 = vmatpush3.bf16.msra.mxu0 %v395_v5  ;;  %v419_v15 = vpack.c.bf16 %v162_v11, %v161_v10  ;;  %v70_v16 = vld [vmem:[#allocation5 + $0x30] sm:$0xff]  ;;  %v71_v17 = vld [vmem:[#allocation5 + $0x38] sm:$0xff]  ;;  %v422_v18 = vpack.c.bf16 %v164_v13, %v163_v12  ;;  %v165_v19 = vld [vmem:[#allocation7 + $0x20] sm:$0xff]  ;;  %p519_p10 = scmp.ne.s32.totalorder %s265_s11, %s518_s12  ;;  %p524_p12 = scmp.lt.s32.totalorder %s518_s12, %s518_s12 }
  0x3c   :  { %397 = vmatprep.subr.bf16.mxu0 %v575_v0  ;;  %v166_v20 = vld [vmem:[#allocation7 + $0x28] sm:$0xff]  ;;  %v404_v21 = vpack.c.bf16 %v71_v17, %v70_v16  ;;  %v72_v22 = vld [vmem:[#allocation5 + $0x40] sm:$0xff]  ;;  %v167_v25 = vld [vmem:[#allocation7 + $0x30] sm:$0xff] }
  0x3d   :  { %420 = vmatpush3.bf16.msra.mxu1 %v419_v15  ;;  %v73_v23 = vld [vmem:[#allocation5 + $0x48] sm:$0xff]  ;;  %v425_v24 = vpack.c.bf16 %v166_v20, %v165_v19  ;;  %v168_v26 = vld [vmem:[#allocation7 + $0x38] sm:$0xff]  ;;  %v74_v28 = vld [vmem:[#allocation5 + $0x50] sm:$0xff]  ;;  %p525_p13 = por %p524_p12, %p523_p11 }
  0x3e   :  { %421 = vmatprep.subr.bf16.mxu1 %v575_v0  ;;  %v407_v27 = vpack.c.bf16 %v73_v23, %v72_v22  ;;  %v75_v29 = vld [vmem:[#allocation5 + $0x58] sm:$0xff]  ;;  %v428_v30 = vpack.c.bf16 %v168_v26, %v167_v25  ;;  %v169_v31 = vld [vmem:[#allocation7 + $0x40] sm:$0xff]  ;;  %v170_v32 = vld [vmem:[#allocation7 + $0x48] sm:$0xff] }
  0x3f   :  { %399 = vmatpush3.bf16.msra.mxu0 %v398_v7  ;;  %v410_v33 = vpack.c.bf16 %v75_v29, %v74_v28  ;;  %v76_v34 = vld [vmem:[#allocation5 + $0x60] sm:$0xff]  ;;  %v77_v35 = vld [vmem:[#allocation5 + $0x68] sm:$0xff]  ;;  %v431_v36 = vpack.c.bf16 %v170_v32, %v169_v31  ;;  %v171_v37 = vld [vmem:[#allocation7 + $0x50] sm:$0xff]  ;;  %p526_p0 = pnand %p525_p13, %p519_p10 }
  0x40   :  { %400 = vmatprep.subr.bf16.mxu0 %v575_v0  ;;  %v172_v38 = vld [vmem:[#allocation7 + $0x58] sm:$0xff]  ;;  %v413_v39 = vpack.c.bf16 %v77_v35, %v76_v34  ;;  %v78_v40 = vld [vmem:[#allocation5 + $0x70] sm:$0xff]  ;;  %v173_v43 = vld [vmem:[#allocation7 + $0x60] sm:$0xff] }
  0x41   :  { %423 = vmatpush3.bf16.msra.mxu1 %v422_v18  ;;  %v79_v41 = vld [vmem:[#allocation5 + $0x78] sm:$0xff]  ;;  %v434_v42 = vpack.c.bf16 %v172_v38, %v171_v37  ;;  %v174_v44 = vld [vmem:[#allocation7 + $0x68] sm:$0xff]  ;;  %v175_v48 = vld [vmem:[#allocation7 + $0x70] sm:$0xff] }
  0x42   :  { %424 = vmatprep.subr.bf16.mxu1 %v575_v0  ;;  %v416_v45 = vpack.c.bf16 %v79_v41, %v78_v40  ;;  %v437_v46 = vpack.c.bf16 %v174_v44, %v173_v43  ;;  %v63_v47 = vld [vmem:[#allocation2] sm:$0xff] }
  0x43   :  { %402 = vmatpush3.bf16.msra.mxu0 %v401_v14  ;;  %v176_v49 = vld [vmem:[#allocation7 + $0x78] sm:$0xff] }
  0x44   :  { %403 = vmatprep.subr.bf16.mxu0 %v575_v0  ;;  %v440_v50 = vpack.c.bf16 %v176_v49, %v175_v48  ;;  %v288_v51 = vld [vmem:[%s705_s2] ss:$0 sm:$0xff] }
  0x45   :  { %426 = vmatpush3.bf16.msra.mxu1 %v425_v24 }
  0x46   :  { %427 = vmatprep.subr.bf16.mxu1 %v575_v0 }
  0x47   :  { %405 = vmatpush3.bf16.msra.mxu0 %v404_v21 }
  0x48   :  { %406 = vmatprep.subr.bf16.mxu0 %v575_v0 }
  0x49   :  { %429 = vmatpush3.bf16.msra.mxu1 %v428_v30 }
  0x4a   :  { %430 = vmatprep.subr.bf16.mxu1 %v575_v0 }
  0x4b   :  { %408 = vmatpush3.bf16.msra.mxu0 %v407_v27 }
  0x4c   :  { %409 = vmatprep.subr.bf16.mxu0 %v575_v0 }
  0x4d   :  { %432 = vmatpush3.bf16.msra.mxu1 %v431_v36 }
  0x4e   :  { %433 = vmatprep.subr.bf16.mxu1 %v575_v0 }
  0x4f   :  { %411 = vmatpush3.bf16.msra.mxu0 %v410_v33 }
  0x50   :  { %412 = vmatprep.subr.bf16.mxu0 %v575_v0 }
  0x51   :  { %435 = vmatpush3.bf16.msra.mxu1 %v434_v42 }
  0x52   :  { %436 = vmatprep.subr.bf16.mxu1 %v575_v0 }
  0x53   :  { %414 = vmatpush3.bf16.msra.mxu0 %v413_v39 }
  0x54   :  { %415 = vmatprep.subr.bf16.mxu0 %v575_v0 }
  0x55   :  { %438 = vmatpush3.bf16.msra.mxu1 %v437_v46 }
  0x56   :  { %439 = vmatprep.subr.bf16.mxu1 %v575_v0 }
  0x57   :  { %417 = vmatpush3.bf16.msra.mxu0 %v416_v45 }
  0x59   :  { %441 = vmatpush3.bf16.msra.mxu1 %v440_v50 }
  0x5a   :  { %357 = vmatmul.mubr.f32.vlgmr.msra.gmra.mrb[0].mxu0 %v63_v47 }
 0x12d   :  { %v153_v52 = vpop.f32.mrb[0].mxu0 }
 0x12e   :  { %v154_v53 = vadd.f32 %v288_v51, %v153_v52  ;;  %v358_v54 = vpop.f32.mrb[1].mxu0 }
 0x130   :  { %v158_v55 = vmul.f32 0.2, %v154_v53  ;;  %vm157_vm1 = vcmp.ge.f32.partialorder %v154_v53, 0.0 }
 0x132   :  { %v159_v56 = vsel %vm157_vm1, %v154_v53, %v158_v55 }
 0x133   :  { %392 = vmatmul.mubr.f32.vlgmr.msra.gmra.mrb[0].mxu1 %v159_v56  ;;  %160 = vst [vmem:[#allocation8] sm:$0xff] %v159_v56 }
 0x134   :  { %529 = shalt.err (!%p526_p0)
}
 0x135   :  { %s530_s14 = scalar_lea.hbm %s708_s5, 128 }
 0x136   :  { %p531_p1 = scmp.ne.s32.totalorder %s708_s5, %s530_s14  ;;  %p534_p2 = scmp.lt.u32.totalorder %s530_s14, %s708_s5 }
 0x138   :  { %p536_p3 = pnand %p534_p2, %p531_p1 }
 0x13a   :  { %539 = shalt.err (!%p536_p3)
}
 0x13b   :  { %267 = dma.vmem_to_hbm [thread:$0]  %s265_s11, 128, %s708_s5, [#allocation4]   ;;  %v289_v57 = vld [vmem:[%s707_s4] ss:$0 sm:$0xff] }
 0x13c   :  { %s579_s22 = smov [#allocation9]  }
 0x13d   :  { %s274_s23 = sshll.u32 %s579_s22, 4  ;;  %s275_s23 = int_to_ptr.vmem [resolvable:$true] %s274_s23 }
 0x13e   :  { %s540_s24 = scalar_lea.vmem %s275_s23, 128  ;;  %p545_p5 = scmp.lt.s32.totalorder %s275_s23, %s275_s23 }
 0x13f   :  { %p541_p4 = scmp.ne.s32.totalorder %s275_s23, %s540_s24  ;;  %p546_p6 = scmp.lt.s32.totalorder %s540_s24, %s540_s24 }
 0x141   :  { %p547_p7 = por %p546_p6, %p545_p5 }
 0x143   :  { %p548_p8 = pnand %p547_p7, %p541_p4 }
 0x206   :  { %v250_v58 = vpop.f32.mrb[0].mxu1 }
 0x207   :  { %v251_v59 = vadd.f32 %v289_v57, %v250_v58  ;;  %v393_v60 = vpop.f32.mrb[1].mxu1 }
 0x209   :  { %v255_v61 = vmul.f32 0.2, %v251_v59  ;;  %vm254_vm2 = vcmp.ge.f32.partialorder %v251_v59, 0.0 }
 0x20b   :  { %v256_v62 = vsel %vm254_vm2, %v251_v59, %v255_v61 }
 0x20c   :  { %257 = vst [vmem:[#allocation9] sm:$0xff] %v256_v62 }
 0x20d   :  { %551 = shalt.err (!%p548_p8)
}
 0x20e   :  { %s552_s4 = scalar_lea.hbm %s709_s6, 128 }
 0x20f   :  { %p553_p9 = scmp.ne.s32.totalorder %s709_s6, %s552_s4  ;;  %p556_p10 = scmp.lt.u32.totalorder %s552_s4, %s709_s6 }
 0x211   :  { %p558_p11 = pnand %p556_p10, %p553_p9 }
 0x213   :  { %561 = shalt.err (!%p558_p11)
}
 0x214   :  { %277 = dma.vmem_to_hbm [thread:$0]  %s275_s23, 128, %s709_s6, [#allocation10]  }
 0x215   :  { %566 = dma.done.wait [#allocation4], 128  }
 0x216   :  { %567 = vsyncadd [#allocation4], 4294967168 }
 0x217   :  { %568 = dma.done.wait [#allocation10], 128  }
 0x218   :  { %569 = vsyncadd [#allocation10], 4294967168 }
 0x219   :  { %284 = vsyncpa [#allocation3], 1 }
 0x21a   :  { %285 = vsyncpa [#allocation6], 1 }
 0x21b   :  { %286 = vsyncpa [#allocation4], 1 }
 0x21c   :  { %287 = vsyncpa [#allocation10], 1 }

</bundles_post_ra>
